<compile_context>
chip_gen: v7x
topology: tpu7x:2x2x1
jax: 0.10.0
libtpu: 0.0.40
codegen_flags: <defaults>
</compile_context>

<pallas_src>
import functools

import jax
import jax.numpy as jnp
from jax.experimental import pallas as pl
from jax.experimental.pallas import tpu as pltpu

LANES = 128
SUBLANES = 8
CHUNK = SUBLANES * LANES          # 1024 elements: minimum aligned unit
TM_MAX = 8192                     # rows per grid step (4 MiB per f32 input tile)


def _dice_partial_kernel(p_ref, t_ref, o_ref, *, folds_full, folds_last):
    """Per-block partial sums.

    o[0, 0] = folded sum(p * t)   as an (8, 128) f32 vreg
    o[0, 1] = folded sum(p + t)   as an (8, 128) f32 vreg
    """

    def run(n_folds):
        def body(k, carry):
            pt_acc, ps_acc = carry
            r = pl.multiple_of(k * SUBLANES, SUBLANES)
            p = p_ref[pl.ds(r, SUBLANES), :].astype(jnp.float32)
            t = t_ref[pl.ds(r, SUBLANES), :].astype(jnp.float32)
            return pt_acc + p * t, ps_acc + (p + t)

        zero = jnp.zeros((SUBLANES, LANES), jnp.float32)
        pt_acc, ps_acc = jax.lax.fori_loop(
            0, n_folds, body, (zero, zero), unroll=min(8, n_folds)
        )
        o_ref[0, 0] = pt_acc
        o_ref[0, 1] = ps_acc

    if folds_last == folds_full:
        # Uniform blocks: single statically-unrolled loop, no branch at all.
        run(folds_full)
    else:
        # Only the final block is short; every other block runs the full loop.
        i = pl.program_id(0)
        nb = pl.num_programs(0)

        @pl.when(i < nb - 1)
        def _():
            run(folds_full)

        @pl.when(i == nb - 1)
        def _():
            run(folds_last)


def _dice_partials(p2, t2, rows, tm):
    num_blocks = pl.cdiv(rows, tm)
    folds_full = tm // SUBLANES
    last_rows = rows - (num_blocks - 1) * tm   # >0, multiple of 8
    folds_last = last_rows // SUBLANES

    return pl.pallas_call(
        functools.partial(
            _dice_partial_kernel, folds_full=folds_full, folds_last=folds_last
        ),
        out_shape=jax.ShapeDtypeStruct(
            (num_blocks, 2, SUBLANES, LANES), jnp.float32
        ),
        grid_spec=pltpu.PrefetchScalarGridSpec(
            num_scalar_prefetch=0,
            grid=(num_blocks,),
            in_specs=[
                pl.BlockSpec((tm, LANES), lambda i: (i, 0)),
                pl.BlockSpec((tm, LANES), lambda i: (i, 0)),
            ],
            out_specs=pl.BlockSpec(
                (1, 2, SUBLANES, LANES), lambda i: (i, 0, 0, 0)
            ),
        ),
        compiler_params=pltpu.CompilerParams(
            dimension_semantics=("parallel",),
            vmem_limit_bytes=48 << 20,
        ),
    )(p2, t2)


def dice_loss(predictions, targets, smooth=1.0):
    """Pallas implementation of DiceLoss.forward. Returns a scalar float32."""
    p = jnp.ravel(predictions)   # keep native dtype; cast happens in-kernel
    t = jnp.ravel(targets)
    n = p.shape[0]

    # Largest prefix that is a multiple of 8*128 goes through the kernel.
    n_main = (n // CHUNK) * CHUNK

    inter = jnp.float32(0.0)
    denom = jnp.float32(0.0)

    if n_main > 0:
        # Zero-copy when n is CHUNK-aligned (common case); otherwise a prefix
        # slice instead of a full-array jnp.pad round-trip through HBM.
        # TODO(synk): for the ragged case, verify in HLO that the prefix slice
        # is not materialized; a manual-DMA (pl.ANY) path would be zero-copy.
        p_main = p if n_main == n else p[:n_main]
        t_main = t if n_main == n else t[:n_main]
        rows = n_main // LANES                # multiple of 8 by construction
        p2 = p_main.reshape(rows, LANES)
        t2 = t_main.reshape(rows, LANES)
        tm = min(TM_MAX, rows)                # multiple of 8

        partials = _dice_partials(p2, t2, rows, tm)
        # Single fused reduction over the tiny partials tensor.
        sums = jnp.sum(partials, axis=(0, 2, 3))
        inter = inter + sums[0]
        denom = denom + sums[1]

    if n_main != n:
        # <= 1023 trailing elements: negligible, handled in plain JAX.
        p_tail = p[n_main:].astype(jnp.float32)
        t_tail = t[n_main:].astype(jnp.float32)
        inter = inter + jnp.sum(p_tail * t_tail)
        denom = denom + jnp.sum(p_tail) + jnp.sum(t_tail)

    dice = (2.0 * inter + smooth) / (denom + smooth)
    return (1.0 - dice).astype(jnp.float32)


def _reference_dice_loss(predictions, targets, smooth=1.0):
    p = jnp.ravel(predictions).astype(jnp.float32)
    t = jnp.ravel(targets).astype(jnp.float32)
    inter = jnp.sum(p * t)
    dice = (2.0 * inter + smooth) / (jnp.sum(p) + jnp.sum(t) + smooth)
    return 1.0 - dice


if __name__ == "__main__":
    key = jax.random.PRNGKey(0)
    k1, k2 = jax.random.split(key)
    # Shapes consistent with a segmentation head: (N, C, H, W)
    predictions = jax.nn.sigmoid(
        jax.random.normal(k1, (2, 4, 16, 16), dtype=jnp.float32)
    )
    targets = (
        jax.random.uniform(k2, (2, 4, 16, 16), dtype=jnp.float32) > 0.5
    ).astype(jnp.float32)

    loss = dice_loss(predictions, targets, smooth=1.0)
    loss = jax.block_until_ready(loss)

    ref = _reference_dice_loss(predictions, targets, smooth=1.0)
    assert jnp.allclose(loss, ref, atol=1e-5, rtol=1e-5), (loss, ref)
    print("KERNEL_OK")
</pallas_src>

<mosaic_0001>
module attributes {stable_mosaic.version = 11 : i64} {
  func.func @_dice_partial_kernel(%arg0: i32, %arg1: memref<16x128xf32, #tpu.memory_space<vmem>>, %arg2: memref<16x128xf32, #tpu.memory_space<vmem>>, %arg3: memref<1x2x8x128xf32, #tpu.memory_space<vmem>>) attributes {dimension_semantics = [#tpu.dimension_semantics<parallel>], iteration_bounds = array<i64: 1>, scalar_prefetch = 0 : i64, scratch_operands = 0 : i64, tpu.core_type = #tpu.core_type<tc>, window_params = [{transform_indices = @transform_0, window_bounds = array<i64: 16, 128>}, {transform_indices = @transform_1, window_bounds = array<i64: 16, 128>}, {transform_indices = @transform_2, window_bounds = array<i64: 1, 2, 8, 128>}]} {
    %cst = arith.constant 0.000000e+00 : f32
    %0 = vector.broadcast %cst : f32 to vector<8x128xf32>
    %c0_i32 = arith.constant 0 : i32
    %c8_i32 = arith.constant 8 : i32
    %1 = arith.muli %c0_i32, %c8_i32 : i32
    %2 = tpu.assume_multiple %1, 8 : i32
    %3 = arith.index_cast %2 : i32 to index
    %c0 = arith.constant 0 : index
    %4 = vector.load %arg1[%3, %c0] : memref<16x128xf32, #tpu.memory_space<vmem>>, vector<8x128xf32>
    %5 = arith.index_cast %2 : i32 to index
    %c0_0 = arith.constant 0 : index
    %6 = vector.load %arg2[%5, %c0_0] : memref<16x128xf32, #tpu.memory_space<vmem>>, vector<8x128xf32>
    %7 = arith.mulf %4, %6 : vector<8x128xf32>
    %8 = arith.addf %0, %7 : vector<8x128xf32>
    %9 = arith.addf %4, %6 : vector<8x128xf32>
    %10 = arith.addf %0, %9 : vector<8x128xf32>
    %c1_i32 = arith.constant 1 : i32
    %c8_i32_1 = arith.constant 8 : i32
    %11 = arith.muli %c1_i32, %c8_i32_1 : i32
    %12 = tpu.assume_multiple %11, 8 : i32
    %13 = arith.index_cast %12 : i32 to index
    %c0_2 = arith.constant 0 : index
    %14 = vector.load %arg1[%13, %c0_2] : memref<16x128xf32, #tpu.memory_space<vmem>>, vector<8x128xf32>
    %15 = arith.index_cast %12 : i32 to index
    %c0_3 = arith.constant 0 : index
    %16 = vector.load %arg2[%15, %c0_3] : memref<16x128xf32, #tpu.memory_space<vmem>>, vector<8x128xf32>
    %17 = arith.mulf %14, %16 : vector<8x128xf32>
    %18 = arith.addf %8, %17 : vector<8x128xf32>
    %19 = arith.addf %14, %16 : vector<8x128xf32>
    %20 = arith.addf %10, %19 : vector<8x128xf32>
    %c2_i32 = arith.constant 2 : i32
    %c0_4 = arith.constant 0 : index
    %c0_5 = arith.constant 0 : index
    %c0_6 = arith.constant 0 : index
    %c0_7 = arith.constant 0 : index
    %21 = vector.load %arg3[%c0_4, %c0_5, %c0_6, %c0_7] : memref<1x2x8x128xf32, #tpu.memory_space<vmem>>, vector<1x1x8x128xf32>
    %22 = vector.shape_cast %21 : vector<1x1x8x128xf32> to vector<8x128xf32>
    %23 = vector.shape_cast %18 : vector<8x128xf32> to vector<1x1x8x128xf32>
    tpu.vector_store %arg3[%c0_4, %c0_5, %c0_6, %c0_7], %23 {strides = array<i32>} : memref<1x2x8x128xf32, #tpu.memory_space<vmem>>, vector<1x1x8x128xf32>,
    %c0_8 = arith.constant 0 : index
    %c1 = arith.constant 1 : index
    %c0_9 = arith.constant 0 : index
    %c0_10 = arith.constant 0 : index
    %24 = vector.load %arg3[%c0_8, %c1, %c0_9, %c0_10] : memref<1x2x8x128xf32, #tpu.memory_space<vmem>>, vector<1x1x8x128xf32>
    %25 = vector.shape_cast %24 : vector<1x1x8x128xf32> to vector<8x128xf32>
    %26 = vector.shape_cast %20 : vector<8x128xf32> to vector<1x1x8x128xf32>
    tpu.vector_store %arg3[%c0_8, %c1, %c0_9, %c0_10], %26 {strides = array<i32>} : memref<1x2x8x128xf32, #tpu.memory_space<vmem>>, vector<1x1x8x128xf32>,
    return
  }
  func.func @transform_0(%arg0: i32) -> (i32, i32) {
    %c0_i32 = arith.constant 0 : i32
    %c0_i32_0 = arith.constant 0 : i32
    return %arg0, %c0_i32 : i32, i32
  }
  func.func @transform_1(%arg0: i32) -> (i32, i32) {
    %c0_i32 = arith.constant 0 : i32
    %c0_i32_0 = arith.constant 0 : i32
    return %arg0, %c0_i32 : i32, i32
  }
  func.func @transform_2(%arg0: i32) -> (i32, i32, i32, i32) {
    %c0_i32 = arith.constant 0 : i32
    %c0_i32_0 = arith.constant 0 : i32
    %c0_i32_1 = arith.constant 0 : i32
    %c0_i32_2 = arith.constant 0 : i32
    return %arg0, %c0_i32, %c0_i32_0, %c0_i32_1 : i32, i32, i32, i32
  }
}

</mosaic_0001>

<bundles_post_ra>
// kernel: tpu_custom_call.1
= control target key start
LH: loop header
LB: loop body
LE: loop exit
PB: predicated region body
PF: predicated region fallthrough
CT: control target
= control target key end

     0   :  { %7 = vsyncpa [#allocation3], 0  ;;  %s217_s0 = inlined_call_operand.hbm [shape: f32[16,128], index: 0, kind: input, shape index: {}]   ;;  %s218_s1 = inlined_call_operand.hbm [shape: f32[16,128], index: 1, kind: input, shape index: {}]   ;;  %s219_s2 = inlined_call_operand.hbm [shape: f32[1,2,8,128], index: 2, kind: output, shape index: {}]  }
   0x1   :  { %8 = vsyncpa [#allocation6], 0 }
   0x2   :  { %9 = vsyncpa [#allocation4], 0  ;;  %s152_s9 = smov [#allocation2]   ;;  %s80_s13 = scalar_lea.hbm %s217_s0, 256 }
   0x3   :  { %s15_s10 = sshll.u32 %s152_s9, 4  ;;  %p81_p0 = scmp.ne.s32.totalorder %s217_s0, %s80_s13  ;;  %s16_s10 = int_to_ptr.vmem [resolvable:$true] %s15_s10 }
   0x4   :  { %p84_p1 = scmp.lt.u32.totalorder %s80_s13, %s217_s0 }
   0x6   :  { %p86_p2 = pnand %p84_p1, %p81_p0 }
   0x8   :  { %89 = shalt.err (!%p86_p2)
}
   0x9   :  { %s90_s18 = scalar_lea.vmem %s16_s10, 256  ;;  %p95_p4 = scmp.lt.s32.totalorder %s16_s10, %s16_s10 }
   0xa   :  { %p91_p3 = scmp.ne.s32.totalorder %s16_s10, %s90_s18  ;;  %p96_p5 = scmp.lt.s32.totalorder %s90_s18, %s90_s18 }
   0xc   :  { %p97_p6 = por %p96_p5, %p95_p4 }
   0xe   :  { %p98_p7 = pnand %p97_p6, %p91_p3 }
  0x10   :  { %101 = shalt.err (!%p98_p7)
}
  0x11   :  { %s153_s19 = smov 128   ;;  %s154_s20 = smov 8  }
  0x12   :  { %21 = dma.hbm_to_vmem [thread:$0]  %s217_s0, 256, %s16_s10, [#allocation3], %s153_s19, %s153_s19, %s154_s20  }
  0x13   :  { %s155_s23 = smov [#allocation5]   ;;  %s102_s27 = scalar_lea.hbm %s218_s1, 256 }
  0x14   :  { %s27_s24 = sshll.u32 %s155_s23, 4  ;;  %p103_p8 = scmp.ne.s32.totalorder %s218_s1, %s102_s27  ;;  %s28_s24 = int_to_ptr.vmem [resolvable:$true] %s27_s24 }
  0x15   :  { %p106_p9 = scmp.lt.u32.totalorder %s102_s27, %s218_s1 }
  0x17   :  { %p108_p10 = pnand %p106_p9, %p103_p8 }
  0x19   :  { %111 = shalt.err (!%p108_p10)
}
  0x1a   :  { %s112_s4 = scalar_lea.vmem %s28_s24, 256  ;;  %p117_p12 = scmp.lt.s32.totalorder %s28_s24, %s28_s24 }
  0x1b   :  { %p113_p11 = scmp.ne.s32.totalorder %s28_s24, %s112_s4  ;;  %p118_p13 = scmp.lt.s32.totalorder %s112_s4, %s112_s4 }
  0x1d   :  { %p119_p0 = por %p118_p13, %p117_p12 }
  0x1f   :  { %p120_p1 = pnand %p119_p0, %p113_p11 }
  0x21   :  { %123 = shalt.err (!%p120_p1)
}
  0x22   :  { %33 = dma.hbm_to_vmem [thread:$0]  %s218_s1, 256, %s28_s24, [#allocation6], %s153_s19, %s153_s19, %s154_s20  }
  0x23   :  { %146 = dma.done.wait [#allocation3], 256  }
  0x24   :  { %147 = vsyncadd [#allocation3], 4294967040 }
  0x25   :  { %148 = dma.done.wait [#allocation6], 256  }
  0x26   :  { %149 = vsyncadd [#allocation6], 4294967040  ;;  %v40_v0 = vld [vmem:[#allocation2] sm:$0xff]  ;;  %v41_v1 = vld [vmem:[#allocation5] sm:$0xff]  ;;  %s156_s6 = smov [#allocation7]  }
  0x27   :  { %v47_v2 = vld [vmem:[#allocation2 + $0x8] sm:$0xff]  ;;  %v42_v3 = vmul.f32 %v41_v1, %v40_v0  ;;  %v49_v4 = vld [vmem:[#allocation5 + $0x8] sm:$0xff]  ;;  %v44_v5 = vadd.f32 %v41_v1, %v40_v0  ;;  %s62_s7 = sshll.u32 %s156_s6, 4  ;;  %s63_s7 = int_to_ptr.vmem [resolvable:$true] %s62_s7 }
  0x28   :  { %v50_v6 = vmul.f32 %v49_v4, %v47_v2  ;;  %v52_v7 = vadd.f32 %v49_v4, %v47_v2  ;;  %s124_s1 = scalar_lea.vmem %s63_s7, 256  ;;  %p129_p3 = scmp.lt.s32.totalorder %s63_s7, %s63_s7 }
  0x29   :  { %p125_p2 = scmp.ne.s32.totalorder %s63_s7, %s124_s1  ;;  %p130_p4 = scmp.lt.s32.totalorder %s124_s1, %s124_s1 }
  0x2a   :  { %v51_v8 = vadd.f32 %v50_v6, %v42_v3  ;;  %v53_v9 = vadd.f32 %v52_v7, %v44_v5 }
  0x2b   :  { %p131_p5 = por %p130_p4, %p129_p3 }
  0x2c   :  { %54 = vst [vmem:[#allocation7] sm:$0xff] %v51_v8  ;;  %56 = vst [vmem:[#allocation7 + $0x8] sm:$0xff] %v53_v9 }
  0x2d   :  { %p132_p6 = pnand %p131_p5, %p125_p2 }
  0x2f   :  { %135 = shalt.err (!%p132_p6)
}
  0x30   :  { %s136_s10 = scalar_lea.hbm %s219_s2, 256 }
  0x31   :  { %p137_p7 = scmp.ne.s32.totalorder %s219_s2, %s136_s10  ;;  %p140_p8 = scmp.lt.u32.totalorder %s136_s10, %s219_s2 }
  0x33   :  { %p142_p9 = pnand %p140_p8, %p137_p7 }
  0x35   :  { %145 = shalt.err (!%p142_p9)
}
  0x36   :  { %68 = dma.vmem_to_hbm [thread:$0]  %s63_s7, 256, %s219_s2, [#allocation4], %s153_s19, %s153_s19, %s154_s20  }
  0x37   :  { %150 = dma.done.wait [#allocation4], 256  }
  0x38   :  { %151 = vsyncadd [#allocation4], 4294967040 }
  0x39   :  { %72 = vsyncpa [#allocation3], 1 }
  0x3a   :  { %73 = vsyncpa [#allocation6], 1 }
  0x3b   :  { %74 = vsyncpa [#allocation4], 1 }

</bundles_post_ra>
